<compile_context>
chip_gen: v7x
topology: tpu7x:2x2x1
jax: 0.10.0
libtpu: 0.0.40
codegen_flags: <defaults>
</compile_context>

<pallas_src>
import functools

import jax
import jax.numpy as jnp
from jax.experimental import pallas as pl
from jax.experimental.pallas import tpu as pltpu


# ----------------------------- Pallas kernel --------------------------------

def _conv_block_kernel(x_ref, m_ref, w1_ref, w2_ref, b_ref, wr_ref, we_ref,
                       o_ref, *, H, W, b_tile, rd):
    """b_tile images per grid step.

    x_ref : (b_tile, C_in, H*W)   activation tile (spatial on lanes)
    m_ref : (9, H*W) f32          precomputed 3x3-tap boundary masks (0/1)
    w1_ref: (C_out, 9*C_in) bf16  conv1 im2col weights, BN folded
    w2_ref: (C_out, 9*C_out) bf16 conv2 im2col weights, BN folded
    b_ref : (C_out, 4) f32        packed biases: [b1 | b2 | b_se1(pad) | b_se2]
    wr_ref: (rd, C_out) f32       squeeze-excite reduce weights
    we_ref: (C_out, rd) f32       squeeze-excite expand weights
    o_ref : (b_tile, C_out, H*W)
    """
    S = H * W
    taps = [(dy, dx) for dy in (-1, 0, 1) for dx in (-1, 0, 1)]

    def im2col(img):
        """img: (C, S) f32 -> (9*C, S) bf16, rows ordered tap-major / channel-minor.

        Lane rotation wraps; the precomputed masks zero exactly the wrapped and
        out-of-image lanes (same 'same'-padding semantics as before)."""
        pieces = []
        for t, (dy, dx) in enumerate(taps):
            k = dy * W + dx
            if k == 0:                          # center tap: mask is all-ones
                pieces.append(img.astype(jnp.bfloat16))
            else:
                shifted = pltpu.roll(img, shift=(-k) % S, axis=1)       # XLU rotate
                pieces.append((shifted * m_ref[t:t + 1, :]).astype(jnp.bfloat16))
        return jnp.concatenate(pieces, axis=0)

    def conv_bn_relu(imgs, w_ref, bias_col):
        # One bf16 MXU matmul per conv: (C_out, 9C) @ (9C, b_tile*S) -> f32.
        patches = jnp.concatenate([im2col(v) for v in imgs], axis=1)
        acc = jnp.dot(w_ref[...], patches, preferred_element_type=jnp.float32)
        return jnp.maximum(acc + bias_col, 0.0)                 # (C_out, b_tile*S) f32

    x_imgs = [x_ref[b].astype(jnp.float32) for b in range(b_tile)]
    y1 = conv_bn_relu(x_imgs, w1_ref, b_ref[:, 0:1])
    # TODO(synk): Dropout2d is the identity at inference; train-mode channel dropout
    # (p=0.3) is not implemented here.
    y2 = conv_bn_relu([y1[:, b * S:(b + 1) * S] for b in range(b_tile)],
                      w2_ref, b_ref[:, 1:2])

    # Squeeze-Excite, per image in the tile (pool only over that image's own lanes).
    for b in range(b_tile):
        seg = y2[:, b * S:(b + 1) * S]                                  # (C_out, S)
        pooled = jnp.mean(seg, axis=1, keepdims=True)                   # (C_out, 1)
        hid = jnp.maximum(
            jnp.dot(wr_ref[...], pooled, preferred_element_type=jnp.float32)
            + b_ref[0:rd, 2:3], 0.0)                                    # (rd, 1)
        gate = jax.nn.sigmoid(
            jnp.dot(we_ref[...], hid, preferred_element_type=jnp.float32)
            + b_ref[:, 3:4])                                            # (C_out, 1)
        o_ref[b] = (seg * gate).astype(o_ref.dtype)                     # lane-dense store


# ------------------------------ glue / params -------------------------------

def fold_bn_conv(w, b, gamma, beta, mean, var, eps=1e-5):
    """Fold eval-mode BatchNorm2d into a conv. w: (C_out, C_in, KH, KW)."""
    scale = gamma / jnp.sqrt(var + eps)
    return w * scale[:, None, None, None], (b - mean) * scale + beta


def _tap_masks(H, W):
    """(9, H*W) 0/1 masks covering 'same'-padding borders (and roll wrap-around)."""
    S = H * W
    lane = jnp.arange(S, dtype=jnp.int32)
    row, col = lane // W, lane % W
    ms = []
    for dy in (-1, 0, 1):
        for dx in (-1, 0, 1):
            ms.append((row + dy >= 0) & (row + dy < H) &
                      (col + dx >= 0) & (col + dx < W))
    return jnp.stack(ms, axis=0).astype(jnp.float32)


def _pick_b_tile(n, s, target_lanes=4096):
    """Images per grid step: amortize per-step overhead, but keep >= 2 grid steps
    when the batch allows so v7x's two TensorCores both get work."""
    bt = max(1, min(n, max(1, target_lanes // max(s, 1))))
    while bt > 1 and (n % bt != 0 or n // bt < 2):
        bt -= 1
    return bt


def init_params(key, in_c, out_c, rd_ratio=1.0 / 16):
    rd = max(1, int(out_c * rd_ratio))
    ks = jax.random.split(key, 10)
    p = {
        "w1": jax.random.normal(ks[0], (out_c, in_c, 3, 3), jnp.float32) * 0.2,
        "b1": jax.random.normal(ks[1], (out_c,), jnp.float32) * 0.1,
        "w2": jax.random.normal(ks[2], (out_c, out_c, 3, 3), jnp.float32) * 0.2,
        "b2": jax.random.normal(ks[3], (out_c,), jnp.float32) * 0.1,
        "w_se1": jax.random.normal(ks[4], (rd, out_c), jnp.float32) * 0.3,
        "b_se1": jax.random.normal(ks[5], (rd,), jnp.float32) * 0.1,
        "w_se2": jax.random.normal(ks[6], (out_c, rd), jnp.float32) * 0.3,
        "b_se2": jax.random.normal(ks[7], (out_c,), jnp.float32) * 0.1,
    }
    for i, name in enumerate(("bn1", "bn2")):
        kk = jax.random.split(ks[8 + i], 4)
        p[f"{name}_gamma"] = 1.0 + 0.1 * jax.random.normal(kk[0], (out_c,), jnp.float32)
        p[f"{name}_beta"] = 0.1 * jax.random.normal(kk[1], (out_c,), jnp.float32)
        p[f"{name}_mean"] = 0.1 * jax.random.normal(kk[2], (out_c,), jnp.float32)
        p[f"{name}_var"] = 1.0 + 0.1 * jnp.abs(jax.random.normal(kk[3], (out_c,), jnp.float32))
    return p


@jax.jit
def conv_block_forward(x, params):
    """x: (N, C_in, H, W) NCHW. Returns (N, C_out, H, W). Eval-mode semantics."""
    N, C_in, H, W = x.shape
    C_out = params["w1"].shape[0]
    rd = params["w_se1"].shape[0]
    S = H * W
    b_tile = _pick_b_tile(N, S)

    w1f, b1f = fold_bn_conv(params["w1"], params["b1"], params["bn1_gamma"],
                            params["bn1_beta"], params["bn1_mean"], params["bn1_var"])
    w2f, b2f = fold_bn_conv(params["w2"], params["b2"], params["bn2_gamma"],
                            params["bn2_beta"], params["bn2_mean"], params["bn2_var"])

    # im2col weight matrices: columns ordered tap-major (ky, kx), channel-minor,
    # matching the row order the kernel builds its patches in. Pre-cast to bf16.
    w1_mat = jnp.transpose(w1f, (0, 2, 3, 1)).reshape(C_out, 9 * C_in).astype(jnp.bfloat16)
    w2_mat = jnp.transpose(w2f, (0, 2, 3, 1)).reshape(C_out, 9 * C_out).astype(jnp.bfloat16)

    # All four bias vectors in one resident VMEM tile: [b1 | b2 | b_se1(pad) | b_se2].
    biases = jnp.zeros((C_out, 4), jnp.float32)
    biases = biases.at[:, 0].set(b1f).at[:, 1].set(b2f)
    biases = biases.at[:rd, 2].set(params["b_se1"]).at[:, 3].set(params["b_se2"])

    masks = _tap_masks(H, W)                      # (9, S) f32, computed once per call
    x_flat = x.reshape(N, C_in, S)                # pure reshape, no HBM transpose

    resident = lambda i: (0, 0)

    out_flat = pl.pallas_call(
        functools.partial(_conv_block_kernel, H=H, W=W, b_tile=b_tile, rd=rd),
        out_shape=jax.ShapeDtypeStruct((N, C_out, S), x.dtype),
        grid_spec=pltpu.PrefetchScalarGridSpec(
            num_scalar_prefetch=0,
            grid=(N // b_tile,),
            in_specs=[
                pl.BlockSpec((b_tile, C_in, S), lambda i: (i, 0, 0)),   # activations
                pl.BlockSpec((9, S), resident),                         # tap masks
                pl.BlockSpec((C_out, 9 * C_in), resident),              # conv1 W (bf16)
                pl.BlockSpec((C_out, 9 * C_out), resident),             # conv2 W (bf16)
                pl.BlockSpec((C_out, 4), resident),                     # packed biases
                pl.BlockSpec((rd, C_out), resident),                    # SE reduce W
                pl.BlockSpec((C_out, rd), resident),                    # SE expand W
            ],
            out_specs=pl.BlockSpec((b_tile, C_out, S), lambda i: (i, 0, 0)),
        ),
        compiler_params=pltpu.CompilerParams(
            dimension_semantics=("parallel",)),   # batch steps shard across TCs
    )(x_flat, masks, w1_mat, w2_mat, biases, params["w_se1"], params["w_se2"])

    return out_flat.reshape(N, C_out, H, W)


def conv_block_ref(x, params, eps=1e-5):
    """Pure-JAX f32 reference (eval-mode BN, Dropout2d = identity)."""
    hp = jax.lax.Precision.HIGHEST

    def conv_bn_relu(v, w, b, g, beta, mean, var):
        y = jax.lax.conv_general_dilated(
            v, w, window_strides=(1, 1), padding=((1, 1), (1, 1)),
            dimension_numbers=("NCHW", "OIHW", "NCHW"), precision=hp)
        y = y + b[None, :, None, None]
        y = (y - mean[None, :, None, None]) \
            * (g / jnp.sqrt(var + eps))[None, :, None, None] \
            + beta[None, :, None, None]
        return jnp.maximum(y, 0.0)

    y = conv_bn_relu(x, params["w1"], params["b1"], params["bn1_gamma"],
                     params["bn1_beta"], params["bn1_mean"], params["bn1_var"])
    y = conv_bn_relu(y, params["w2"], params["b2"], params["bn2_gamma"],
                     params["bn2_beta"], params["bn2_mean"], params["bn2_var"])
    pooled = jnp.mean(y, axis=(2, 3))                                      # (N, C)
    h = jnp.maximum(pooled @ params["w_se1"].T + params["b_se1"], 0.0)     # (N, rd)
    s = jax.nn.sigmoid(h @ params["w_se2"].T + params["b_se2"])            # (N, C)
    return y * s[:, :, None, None]


if __name__ == "__main__":
    # batch=2, in_c=4, out_c=8, spatial 16x16 (H*W = 256 lanes per image)
    N, in_c, out_c, H, W = 2, 4, 8, 16, 16

    key = jax.random.PRNGKey(0)
    kx, kp = jax.random.split(key)
    x = jax.random.normal(kx, (N, in_c, H, W), jnp.float32)
    params = init_params(kp, in_c, out_c)

    out = conv_block_forward(x, params)
    out = jax.block_until_ready(out)

    ref = conv_block_ref(x, params)
    assert out.shape == (N, out_c, H, W)
    err = float(jnp.max(jnp.abs(out - ref)))
    # Tolerance is looser than the old f32-matmul version because both convs now feed
    # the MXU bf16 operands (f32 accumulation); outputs are O(1), so a few e-2 max-abs
    # deviation vs the f32 reference is expected bf16 rounding, not a bug.
    assert err < 7.5e-2, f"mismatch vs reference: {err}"

    print("KERNEL_OK")
</pallas_src>

<mosaic_0001>
module attributes {stable_mosaic.version = 11 : i64} {
  func.func @_conv_block_kernel(%arg0: i32, %arg1: memref<1x4x256xf32, #tpu.memory_space<vmem>>, %arg2: memref<9x256xf32, #tpu.memory_space<vmem>>, %arg3: memref<8x36xbf16, #tpu.memory_space<vmem>>, %arg4: memref<8x72xbf16, #tpu.memory_space<vmem>>, %arg5: memref<8x4xf32, #tpu.memory_space<vmem>>, %arg6: memref<1x8xf32, #tpu.memory_space<vmem>>, %arg7: memref<8x1xf32, #tpu.memory_space<vmem>>, %arg8: memref<1x8x256xf32, #tpu.memory_space<vmem>>) attributes {dimension_semantics = [#tpu.dimension_semantics<parallel>], iteration_bounds = array<i64: 2>, scalar_prefetch = 0 : i64, scratch_operands = 0 : i64, tpu.core_type = #tpu.core_type<tc>, window_params = [{transform_indices = @transform_0, window_bounds = array<i64: 1, 4, 256>}, {pipeline_mode = #tpu.pipeline_mode<synchronous>, transform_indices = @transform_1, window_bounds = array<i64: 9, 256>}, {pipeline_mode = #tpu.pipeline_mode<synchronous>, transform_indices = @transform_2, window_bounds = array<i64: 8, 36>}, {pipeline_mode = #tpu.pipeline_mode<synchronous>, transform_indices = @transform_3, window_bounds = array<i64: 8, 72>}, {pipeline_mode = #tpu.pipeline_mode<synchronous>, transform_indices = @transform_4, window_bounds = array<i64: 8, 4>}, {pipeline_mode = #tpu.pipeline_mode<synchronous>, transform_indices = @transform_5, window_bounds = array<i64: 1, 8>}, {pipeline_mode = #tpu.pipeline_mode<synchronous>, transform_indices = @transform_6, window_bounds = array<i64: 8, 1>}, {transform_indices = @transform_7, window_bounds = array<i64: 1, 8, 256>}]} {
    %c0 = arith.constant 0 : index
    %c0_0 = arith.constant 0 : index
    %c0_1 = arith.constant 0 : index
    %0 = vector.load %arg1[%c0, %c0_0, %c0_1] : memref<1x4x256xf32, #tpu.memory_space<vmem>>, vector<1x4x256xf32>
    %1 = vector.shape_cast %0 : vector<1x4x256xf32> to vector<4x256xf32>
    %c0_2 = arith.constant 0 : index
    %c0_3 = arith.constant 0 : index
    %2 = vector.load %arg5[%c0_2, %c0_3] : memref<8x4xf32, #tpu.memory_space<vmem>>, vector<8x1xf32>
    %c17_i32 = arith.constant 17 : i32
    %3 = tpu.dynamic_rotate %1 by %c17_i32 dim 1 : vector<4x256xf32>, i32 -> vector<4x256xf32>
    %c0_4 = arith.constant 0 : index
    %c0_5 = arith.constant 0 : index
    %4 = vector.load %arg2[%c0_4, %c0_5] : memref<9x256xf32, #tpu.memory_space<vmem>>, vector<1x256xf32>
    %5 = vector.broadcast %4 : vector<1x256xf32> to vector<4x256xf32>
    %6 = arith.mulf %3, %5 : vector<4x256xf32>
    %7 = arith.truncf %6 : vector<4x256xf32> to vector<4x256xbf16>
    %c16_i32 = arith.constant 16 : i32
    %8 = tpu.dynamic_rotate %1 by %c16_i32 dim 1 : vector<4x256xf32>, i32 -> vector<4x256xf32>
    %c1 = arith.constant 1 : index
    %c0_6 = arith.constant 0 : index
    %9 = vector.load %arg2[%c1, %c0_6] : memref<9x256xf32, #tpu.memory_space<vmem>>, vector<1x256xf32>
    %10 = vector.broadcast %9 : vector<1x256xf32> to vector<4x256xf32>
    %11 = arith.mulf %8, %10 : vector<4x256xf32>
    %12 = arith.truncf %11 : vector<4x256xf32> to vector<4x256xbf16>
    %c15_i32 = arith.constant 15 : i32
    %13 = tpu.dynamic_rotate %1 by %c15_i32 dim 1 : vector<4x256xf32>, i32 -> vector<4x256xf32>
    %c2 = arith.constant 2 : index
    %c0_7 = arith.constant 0 : index
    %14 = vector.load %arg2[%c2, %c0_7] : memref<9x256xf32, #tpu.memory_space<vmem>>, vector<1x256xf32>
    %15 = vector.broadcast %14 : vector<1x256xf32> to vector<4x256xf32>
    %16 = arith.mulf %13, %15 : vector<4x256xf32>
    %17 = arith.truncf %16 : vector<4x256xf32> to vector<4x256xbf16>
    %c1_i32 = arith.constant 1 : i32
    %18 = tpu.dynamic_rotate %1 by %c1_i32 dim 1 : vector<4x256xf32>, i32 -> vector<4x256xf32>
    %c3 = arith.constant 3 : index
    %c0_8 = arith.constant 0 : index
    %19 = vector.load %arg2[%c3, %c0_8] : memref<9x256xf32, #tpu.memory_space<vmem>>, vector<1x256xf32>
    %20 = vector.broadcast %19 : vector<1x256xf32> to vector<4x256xf32>
    %21 = arith.mulf %18, %20 : vector<4x256xf32>
    %22 = arith.truncf %21 : vector<4x256xf32> to vector<4x256xbf16>
    %23 = arith.truncf %1 : vector<4x256xf32> to vector<4x256xbf16>
    %c255_i32 = arith.constant 255 : i32
    %24 = tpu.dynamic_rotate %1 by %c255_i32 dim 1 : vector<4x256xf32>, i32 -> vector<4x256xf32>
    %c5 = arith.constant 5 : index
    %c0_9 = arith.constant 0 : index
    %25 = vector.load %arg2[%c5, %c0_9] : memref<9x256xf32, #tpu.memory_space<vmem>>, vector<1x256xf32>
    %26 = vector.broadcast %25 : vector<1x256xf32> to vector<4x256xf32>
    %27 = arith.mulf %24, %26 : vector<4x256xf32>
    %28 = arith.truncf %27 : vector<4x256xf32> to vector<4x256xbf16>
    %c241_i32 = arith.constant 241 : i32
    %29 = tpu.dynamic_rotate %1 by %c241_i32 dim 1 : vector<4x256xf32>, i32 -> vector<4x256xf32>
    %c6 = arith.constant 6 : index
    %c0_10 = arith.constant 0 : index
    %30 = vector.load %arg2[%c6, %c0_10] : memref<9x256xf32, #tpu.memory_space<vmem>>, vector<1x256xf32>
    %31 = vector.broadcast %30 : vector<1x256xf32> to vector<4x256xf32>
    %32 = arith.mulf %29, %31 : vector<4x256xf32>
    %33 = arith.truncf %32 : vector<4x256xf32> to vector<4x256xbf16>
    %c240_i32 = arith.constant 240 : i32
    %34 = tpu.dynamic_rotate %1 by %c240_i32 dim 1 : vector<4x256xf32>, i32 -> vector<4x256xf32>
    %c7 = arith.constant 7 : index
    %c0_11 = arith.constant 0 : index
    %35 = vector.load %arg2[%c7, %c0_11] : memref<9x256xf32, #tpu.memory_space<vmem>>, vector<1x256xf32>
    %36 = vector.broadcast %35 : vector<1x256xf32> to vector<4x256xf32>
    %37 = arith.mulf %34, %36 : vector<4x256xf32>
    %38 = arith.truncf %37 : vector<4x256xf32> to vector<4x256xbf16>
    %c239_i32 = arith.constant 239 : i32
    %39 = tpu.dynamic_rotate %1 by %c239_i32 dim 1 : vector<4x256xf32>, i32 -> vector<4x256xf32>
    %c8 = arith.constant 8 : index
    %c0_12 = arith.constant 0 : index
    %40 = vector.load %arg2[%c8, %c0_12] : memref<9x256xf32, #tpu.memory_space<vmem>>, vector<1x256xf32>
    %41 = vector.broadcast %40 : vector<1x256xf32> to vector<4x256xf32>
    %42 = arith.mulf %39, %41 : vector<4x256xf32>
    %43 = arith.truncf %42 : vector<4x256xf32> to vector<4x256xbf16>
    %44 = tpu.concatenate %7, %12, %17, %22, %23, %28, %33, %38, %43 in 0 : vector<4x256xbf16>, vector<4x256xbf16>, vector<4x256xbf16>, vector<4x256xbf16>, vector<4x256xbf16>, vector<4x256xbf16>, vector<4x256xbf16>, vector<4x256xbf16>, vector<4x256xbf16> -> vector<36x256xbf16>
    %c0_13 = arith.constant 0 : index
    %c0_14 = arith.constant 0 : index
    %45 = vector.load %arg3[%c0_13, %c0_14] : memref<8x36xbf16, #tpu.memory_space<vmem>>, vector<8x36xbf16>
    %cst = arith.constant dense<0.000000e+00> : vector<8x256xf32>
    %46 = tpu.matmul %45, %44, %cst {dimension_numbers = #tpu.dot_dimension_numbers<[1], [0], [0], [1], [0, 0, 1, 1], [], []>} : vector<8x36xbf16>, vector<36x256xbf16>, vector<8x256xf32> -> vector<8x256xf32>
    %47 = vector.broadcast %2 : vector<8x1xf32> to vector<8x256xf32>
    %48 = arith.addf %46, %47 : vector<8x256xf32>
    %cst_15 = arith.constant 0.000000e+00 : f32
    %49 = vector.broadcast %cst_15 : f32 to vector<8x256xf32>
    %50 = arith.maximumf %48, %49 : vector<8x256xf32>
    %c0_16 = arith.constant 0 : index
    %c1_17 = arith.constant 1 : index
    %51 = vector.load %arg5[%c0_16, %c1_17] : memref<8x4xf32, #tpu.memory_space<vmem>>, vector<8x1xf32>
    %c17_i32_18 = arith.constant 17 : i32
    %52 = tpu.dynamic_rotate %50 by %c17_i32_18 dim 1 : vector<8x256xf32>, i32 -> vector<8x256xf32>
    %c0_19 = arith.constant 0 : index
    %c0_20 = arith.constant 0 : index
    %53 = vector.load %arg2[%c0_19, %c0_20] : memref<9x256xf32, #tpu.memory_space<vmem>>, vector<1x256xf32>
    %54 = vector.broadcast %53 : vector<1x256xf32> to vector<8x256xf32>
    %55 = arith.mulf %52, %54 : vector<8x256xf32>
    %56 = arith.truncf %55 : vector<8x256xf32> to vector<8x256xbf16>
    %c16_i32_21 = arith.constant 16 : i32
    %57 = tpu.dynamic_rotate %50 by %c16_i32_21 dim 1 : vector<8x256xf32>, i32 -> vector<8x256xf32>
    %c1_22 = arith.constant 1 : index
    %c0_23 = arith.constant 0 : index
    %58 = vector.load %arg2[%c1_22, %c0_23] : memref<9x256xf32, #tpu.memory_space<vmem>>, vector<1x256xf32>
    %59 = vector.broadcast %58 : vector<1x256xf32> to vector<8x256xf32>
    %60 = arith.mulf %57, %59 : vector<8x256xf32>
    %61 = arith.truncf %60 : vector<8x256xf32> to vector<8x256xbf16>
    %c15_i32_24 = arith.constant 15 : i32
    %62 = tpu.dynamic_rotate %50 by %c15_i32_24 dim 1 : vector<8x256xf32>, i32 -> vector<8x256xf32>
    %c2_25 = arith.constant 2 : index
    %c0_26 = arith.constant 0 : index
    %63 = vector.load %arg2[%c2_25, %c0_26] : memref<9x256xf32, #tpu.memory_space<vmem>>, vector<1x256xf32>
    %64 = vector.broadcast %63 : vector<1x256xf32> to vector<8x256xf32>
    %65 = arith.mulf %62, %64 : vector<8x256xf32>
    %66 = arith.truncf %65 : vector<8x256xf32> to vector<8x256xbf16>
    %c1_i32_27 = arith.constant 1 : i32
    %67 = tpu.dynamic_rotate %50 by %c1_i32_27 dim 1 : vector<8x256xf32>, i32 -> vector<8x256xf32>
    %c3_28 = arith.constant 3 : index
    %c0_29 = arith.constant 0 : index
    %68 = vector.load %arg2[%c3_28, %c0_29] : memref<9x256xf32, #tpu.memory_space<vmem>>, vector<1x256xf32>
    %69 = vector.broadcast %68 : vector<1x256xf32> to vector<8x256xf32>
    %70 = arith.mulf %67, %69 : vector<8x256xf32>
    %71 = arith.truncf %70 : vector<8x256xf32> to vector<8x256xbf16>
    %72 = arith.truncf %50 : vector<8x256xf32> to vector<8x256xbf16>
    %c255_i32_30 = arith.constant 255 : i32
    %73 = tpu.dynamic_rotate %50 by %c255_i32_30 dim 1 : vector<8x256xf32>, i32 -> vector<8x256xf32>
    %c5_31 = arith.constant 5 : index
    %c0_32 = arith.constant 0 : index
    %74 = vector.load %arg2[%c5_31, %c0_32] : memref<9x256xf32, #tpu.memory_space<vmem>>, vector<1x256xf32>
    %75 = vector.broadcast %74 : vector<1x256xf32> to vector<8x256xf32>
    %76 = arith.mulf %73, %75 : vector<8x256xf32>
    %77 = arith.truncf %76 : vector<8x256xf32> to vector<8x256xbf16>
    %c241_i32_33 = arith.constant 241 : i32
    %78 = tpu.dynamic_rotate %50 by %c241_i32_33 dim 1 : vector<8x256xf32>, i32 -> vector<8x256xf32>
    %c6_34 = arith.constant 6 : index
    %c0_35 = arith.constant 0 : index
    %79 = vector.load %arg2[%c6_34, %c0_35] : memref<9x256xf32, #tpu.memory_space<vmem>>, vector<1x256xf32>
    %80 = vector.broadcast %79 : vector<1x256xf32> to vector<8x256xf32>
    %81 = arith.mulf %78, %80 : vector<8x256xf32>
    %82 = arith.truncf %81 : vector<8x256xf32> to vector<8x256xbf16>
    %c240_i32_36 = arith.constant 240 : i32
    %83 = tpu.dynamic_rotate %50 by %c240_i32_36 dim 1 : vector<8x256xf32>, i32 -> vector<8x256xf32>
    %c7_37 = arith.constant 7 : index
    %c0_38 = arith.constant 0 : index
    %84 = vector.load %arg2[%c7_37, %c0_38] : memref<9x256xf32, #tpu.memory_space<vmem>>, vector<1x256xf32>
    %85 = vector.broadcast %84 : vector<1x256xf32> to vector<8x256xf32>
    %86 = arith.mulf %83, %85 : vector<8x256xf32>
    %87 = arith.truncf %86 : vector<8x256xf32> to vector<8x256xbf16>
    %c239_i32_39 = arith.constant 239 : i32
    %88 = tpu.dynamic_rotate %50 by %c239_i32_39 dim 1 : vector<8x256xf32>, i32 -> vector<8x256xf32>
    %c8_40 = arith.constant 8 : index
    %c0_41 = arith.constant 0 : index
    %89 = vector.load %arg2[%c8_40, %c0_41] : memref<9x256xf32, #tpu.memory_space<vmem>>, vector<1x256xf32>
    %90 = vector.broadcast %89 : vector<1x256xf32> to vector<8x256xf32>
    %91 = arith.mulf %88, %90 : vector<8x256xf32>
    %92 = arith.truncf %91 : vector<8x256xf32> to vector<8x256xbf16>
    %93 = tpu.concatenate %56, %61, %66, %71, %72, %77, %82, %87, %92 in 0 : vector<8x256xbf16>, vector<8x256xbf16>, vector<8x256xbf16>, vector<8x256xbf16>, vector<8x256xbf16>, vector<8x256xbf16>, vector<8x256xbf16>, vector<8x256xbf16>, vector<8x256xbf16> -> vector<72x256xbf16>
    %c0_42 = arith.constant 0 : index
    %c0_43 = arith.constant 0 : index
    %94 = vector.load %arg4[%c0_42, %c0_43] : memref<8x72xbf16, #tpu.memory_space<vmem>>, vector<8x72xbf16>
    %cst_44 = arith.constant dense<0.000000e+00> : vector<8x256xf32>
    %95 = tpu.matmul %94, %93, %cst_44 {dimension_numbers = #tpu.dot_dimension_numbers<[1], [0], [0], [1], [0, 0, 1, 1], [], []>} : vector<8x72xbf16>, vector<72x256xbf16>, vector<8x256xf32> -> vector<8x256xf32>
    %96 = vector.broadcast %51 : vector<8x1xf32> to vector<8x256xf32>
    %97 = arith.addf %95, %96 : vector<8x256xf32>
    %cst_45 = arith.constant 0.000000e+00 : f32
    %98 = vector.broadcast %cst_45 : f32 to vector<8x256xf32>
    %99 = arith.maximumf %97, %98 : vector<8x256xf32>
    %cst_46 = arith.constant dense<0.000000e+00> : vector<8xf32>
    %100 = vector.multi_reduction <add>, %99, %cst_46 [1] : vector<8x256xf32> to vector<8xf32>
    %101 = vector.shape_cast %100 : vector<8xf32> to vector<8x1xf32>
    %cst_47 = arith.constant 2.560000e+02 : f32
    %102 = vector.broadcast %cst_47 : f32 to vector<8x1xf32>
    %103 = arith.divf %101, %102 : vector<8x1xf32>
    %c0_48 = arith.constant 0 : index
    %c0_49 = arith.constant 0 : index
    %104 = vector.load %arg6[%c0_48, %c0_49] : memref<1x8xf32, #tpu.memory_space<vmem>>, vector<1x8xf32>
    %cst_50 = arith.constant dense<0.000000e+00> : vector<1x1xf32>
    %105 = tpu.matmul %104, %103, %cst_50 {dimension_numbers = #tpu.dot_dimension_numbers<[1], [0], [0], [1], [0, 0, 1, 1], [], []>} : vector<1x8xf32>, vector<8x1xf32>, vector<1x1xf32> -> vector<1x1xf32>
    %c0_51 = arith.constant 0 : index
    %c2_52 = arith.constant 2 : index
    %106 = vector.load %arg5[%c0_51, %c2_52] : memref<8x4xf32, #tpu.memory_space<vmem>>, vector<1x1xf32>
    %107 = arith.addf %105, %106 : vector<1x1xf32>
    %cst_53 = arith.constant 0.000000e+00 : f32
    %108 = vector.broadcast %cst_53 : f32 to vector<1x1xf32>
    %109 = arith.maximumf %107, %108 : vector<1x1xf32>
    %c0_54 = arith.constant 0 : index
    %c0_55 = arith.constant 0 : index
    %110 = vector.load %arg7[%c0_54, %c0_55] : memref<8x1xf32, #tpu.memory_space<vmem>>, vector<8x1xf32>
    %cst_56 = arith.constant dense<0.000000e+00> : vector<8x1xf32>
    %111 = tpu.matmul %110, %109, %cst_56 {dimension_numbers = #tpu.dot_dimension_numbers<[1], [0], [0], [1], [0, 0, 1, 1], [], []>} : vector<8x1xf32>, vector<1x1xf32>, vector<8x1xf32> -> vector<8x1xf32>
    %c0_57 = arith.constant 0 : index
    %c3_58 = arith.constant 3 : index
    %112 = vector.load %arg5[%c0_57, %c3_58] : memref<8x4xf32, #tpu.memory_space<vmem>>, vector<8x1xf32>
    %113 = arith.addf %111, %112 : vector<8x1xf32>
    %114 = arith.negf %113 : vector<8x1xf32>
    %115 = math.exp %114 : vector<8x1xf32>
    %cst_59 = arith.constant 1.000000e+00 : f32
    %116 = vector.broadcast %cst_59 : f32 to vector<8x1xf32>
    %117 = arith.addf %116, %115 : vector<8x1xf32>
    %118 = arith.divf %116, %117 : vector<8x1xf32>
    %119 = vector.broadcast %118 : vector<8x1xf32> to vector<8x256xf32>
    %120 = arith.mulf %99, %119 : vector<8x256xf32>
    %c0_60 = arith.constant 0 : index
    %c0_61 = arith.constant 0 : index
    %c0_62 = arith.constant 0 : index
    %121 = vector.load %arg8[%c0_60, %c0_61, %c0_62] : memref<1x8x256xf32, #tpu.memory_space<vmem>>, vector<1x8x256xf32>
    %122 = vector.shape_cast %121 : vector<1x8x256xf32> to vector<8x256xf32>
    %123 = vector.shape_cast %120 : vector<8x256xf32> to vector<1x8x256xf32>
    tpu.vector_store %arg8[%c0_60, %c0_61, %c0_62], %123 {strides = array<i32>} : memref<1x8x256xf32, #tpu.memory_space<vmem>>, vector<1x8x256xf32>,
    return
  }
  func.func @transform_0(%arg0: i32) -> (i32, i32, i32) {
    %c0_i32 = arith.constant 0 : i32
    %c0_i32_0 = arith.constant 0 : i32
    %c0_i32_1 = arith.constant 0 : i32
    return %arg0, %c0_i32, %c0_i32_0 : i32, i32, i32
  }
  func.func @transform_1(%arg0: i32) -> (i32, i32) {
    %c0_i32 = arith.constant 0 : i32
    %c0_i32_0 = arith.constant 0 : i32
    %c0_i32_1 = arith.constant 0 : i32
    return %c0_i32, %c0_i32_0 : i32, i32
  }
  func.func @transform_2(%arg0: i32) -> (i32, i32) {
    %c0_i32 = arith.constant 0 : i32
    %c0_i32_0 = arith.constant 0 : i32
    %c0_i32_1 = arith.constant 0 : i32
    return %c0_i32, %c0_i32_0 : i32, i32
  }
  func.func @transform_3(%arg0: i32) -> (i32, i32) {
    %c0_i32 = arith.constant 0 : i32
    %c0_i32_0 = arith.constant 0 : i32
    %c0_i32_1 = arith.constant 0 : i32
    return %c0_i32, %c0_i32_0 : i32, i32
  }
  func.func @transform_4(%arg0: i32) -> (i32, i32) {
    %c0_i32 = arith.constant 0 : i32
    %c0_i32_0 = arith.constant 0 : i32
    %c0_i32_1 = arith.constant 0 : i32
    return %c0_i32, %c0_i32_0 : i32, i32
  }
  func.func @transform_5(%arg0: i32) -> (i32, i32) {
    %c0_i32 = arith.constant 0 : i32
    %c0_i32_0 = arith.constant 0 : i32
    %c0_i32_1 = arith.constant 0 : i32
    return %c0_i32, %c0_i32_0 : i32, i32
  }
  func.func @transform_6(%arg0: i32) -> (i32, i32) {
    %c0_i32 = arith.constant 0 : i32
    %c0_i32_0 = arith.constant 0 : i32
    %c0_i32_1 = arith.constant 0 : i32
    return %c0_i32, %c0_i32_0 : i32, i32
  }
  func.func @transform_7(%arg0: i32) -> (i32, i32, i32) {
    %c0_i32 = arith.constant 0 : i32
    %c0_i32_0 = arith.constant 0 : i32
    %c0_i32_1 = arith.constant 0 : i32
    return %arg0, %c0_i32, %c0_i32_0 : i32, i32, i32
  }
}

</mosaic_0001>

<bundles_post_ra>
// kernel: conv_block_forward.1
= control target key start
LH: loop header
LB: loop body
LE: loop exit
PB: predicated region body
PF: predicated region fallthrough
CT: control target
= control target key end

     0   :  { %s1160_s24 = smov 0   ;;  %s1496_s0 = inlined_call_operand.vmem [shape: f32[2,4,256], index: 0, kind: input, shape index: {}]   ;;  %s1497_s1 = inlined_call_operand.vmem [shape: f32[9,256], index: 1, kind: input, shape index: {}]   ;;  %s1498_s2 = inlined_call_operand.vmem [shape: bf16[8,36], index: 2, kind: input, shape index: {}]   ;;  %s1499_s3 = inlined_call_operand.vmem [shape: bf16[8,72], index: 3, kind: input, shape index: {}]   ;;  %s1500_s4 = inlined_call_operand.vmem [shape: f32[8,4], index: 4, kind: input, shape index: {}]   ;;  %s1501_s5 = inlined_call_operand.vmem [shape: f32[1,8], index: 5, kind: input, shape index: {}]   ;;  %s1502_s6 = inlined_call_operand.vmem [shape: f32[8,1], index: 6, kind: input, shape index: {}]   ;;  %s1503_s7 = inlined_call_operand.vmem [shape: f32[2,8,256], index: 7, kind: output, shape index: {}]  }
   0x1 LB: > { %s1026_s25 = sadd.s32 4294967295, %s1104_s24   ;;  %p1030_p0 = scmp.ge.s32.totalorder %s1104_s24, 1  ;;  %s1104_s24 = sphi %s1160_s24, %s17_s24  }
   0x2   : > { %p237_p1 = scmp.lt.s32.totalorder %s1104_s24, 3 }
   0x4   : > { %p238_p2 = pnand %p1030_p0, %p237_p1 }
   0x5   : > { %p269_p3 = scmp.lt.s32.totalorder (!%p238_p2), %s1026_s25, 1  ;;  %s1106_s30 = smov (!%p238_p2), 15   ;;  %v1113_v2 = vmov (!%p238_p2), 0   ;;  %v1218_v3 = vld [vmem:[%s1500_s4] sm:$0xff] (!%p238_p2)  ;;  %v289_v4 = vlaneseq (!%p238_p2)  ;;  %vm504_vm4 = vcmask (!%p238_p2), 1041408   ;;  %vm511_vm6 = vcmask (!%p238_p2), 1043456  }
   0x6   : > { %241 = sbr.rel (%p238_p2) target bundleno = 1497 (0x5d9), region = 48  ;;  %s1107_s8 = smov (!%p238_p2), 16   ;;  %587 = vmatprep.mubr.bf16.mxu0 (!%p238_p2), %v1113_v2  ;;  %1090 = vset.pattern.permute.xlu0 (!%p238_p2), %v1113_v2  ;;  %v1036_v11 = vld [vmem:[%s1497_s1 + $0x2] ss:$8 sm:$0x3] (!%p238_p2)  ;;  %vm516_vm8 = vcmask (!%p238_p2), 1045504  }
   0x7   : > { %s1108_s9 = smov (!%p238_p2), 17   ;;  %s1109_s10 = smov (!%p238_p2), 1   ;;  %777 = vmatprep.mubr.bf16.mxu1 (!%p238_p2), %v1113_v2  ;;  %v297_v5 = vshrl.u32 (!%p238_p2), %v289_v4, 7  ;;  %v1221_v6 = vand.u32 (!%p238_p2), 127, %v289_v4  ;;  %vm545_vm11 = vcmask (!%p238_p2), 293888   ;;  %vm735_vm12 = vcmask (!%p238_p2), 588800  }
   0x8   : > { %s1110_s11 = smov (!%p238_p2), 127   ;;  %s1111_s12 = smov (!%p238_p2), 113   ;;  %v294_v12 = vld [vmem:[%s1497_s1] ss:$8 sm:$0x3] (!%p238_p2)  ;;  %vm1117_vm13 = vmmov (!%p238_p2), 0  }
   0x9   : > { %s1112_s13 = smov (!%p238_p2), 112   ;;  %s1114_s14 = smov (!%p238_p2), 111   ;;  %v1223_v9 = vsub.s32 (!%p238_p2), 0, %v297_v5  ;;  %v1225_v10 = vsub.s32 (!%p238_p2), 1, %v297_v5  ;;  %vm338_vm0 = vcmp.lt.s32.totalorder (!%p238_p2), %v1221_v6, 15  ;;  %vm291_vm1 = vcmp.lt.s32.totalorder (!%p238_p2), %v1221_v6, 17 }
   0xa   : > { %v1035_v17 = vld [vmem:[%s1497_s1 + $0x1] ss:$8 sm:$0x3] (!%p238_p2)  ;;  %v1037_v18 = vld [vmem:[%s1497_s1 + $0x3] ss:$8 sm:$0x3] (!%p238_p2) }
   0xb   : > { %v1235_v14 = vrot.slane (!%p238_p2), %v1036_v11, %v1223_v9  ;;  %v1238_v15 = vrot.slane (!%p238_p2), %v1036_v11, %v1225_v10  ;;  %v1252_v21 = vrot.slane (!%p238_p2), %v294_v12, %v1223_v9  ;;  %v1255_v22 = vrot.slane (!%p238_p2), %v294_v12, %v1225_v10  ;;  %v1038_v26 = vld [vmem:[%s1497_s1 + $0x5] ss:$8 sm:$0x3] (!%p238_p2)  ;;  %v1039_v36 = vld [vmem:[%s1497_s1 + $0x6] ss:$8 sm:$0x3] (!%p238_p2) }
   0xc   : > { %vm314_vm2 = vcmp.lt.s32.totalorder (!%p238_p2), %v1221_v6, 16  ;;  %v1259_v23 = vrot.slane (!%p238_p2), %v1035_v17, %v1223_v9  ;;  %v1262_v24 = vrot.slane (!%p238_p2), %v1035_v17, %v1225_v10  ;;  %vm362_vm3 = vcmp.lt.s32.totalorder (!%p238_p2), %v1221_v6, 1 }
   0xd   : > { %s1505_s25 = smov (!%p269_p3, %s1026_s25), 1  ;;  %v1266_v25 = vrot.slane %v1037_v18, %v1223_v9  ;;  %v1274_v31 = vrot.slane %v1037_v18, %v1225_v10  ;;  %vm388_vm5 = vcmp.lt.s32.totalorder %v1221_v6, 127  ;;  %v1289_v37 = vrot.slane %v1038_v26, %v1223_v9 }
   0xe   : > { %s1052_s26 = sshll.u32 %s1505_s25, 3  ;;  %v1292_v38 = vrot.slane %v1038_v26, %v1225_v10  ;;  %vm412_vm7 = vcmp.lt.s32.totalorder %v1221_v6, 113  ;;  %v1300_v47 = vrot.slane %v1039_v36, %v1223_v9  ;;  %v1309_v54 = vrot.slane %v1039_v36, %v1225_v10 }
   0xf   : > { %s273_s29 = scalar_lea.vmem %s1496_s0, %s1052_s26  ;;  %vm436_vm9 = vcmp.lt.s32.totalorder %v1221_v6, 112  ;;  %vm460_vm10 = vcmp.lt.s32.totalorder %v1221_v6, 111  ;;  %v729_v6 = vld [vmem:[%s1499_s3] sm:$0xf]  ;;  %vm799_vm14 = vcmask 64512   ;;  %vm882_vm15 = vcmask 1040384  }
  0x10   : > { %v1174_v0 = vld [vmem:[%s273_s29] sm:$0xff]  ;;  %s1053_s26 = sshll.u32 %s1505_s25, 4 }
  0x11   : > { %334 = vrot.lane.b32.xlu1 %v1174_v0, %s1106_s30  ;;  %310 = vrot.lane.b32.xlu0 %v1174_v0, %s1107_s8  ;;  %v1182_v1 = vcombine.high %v1174_v0, %v1174_v0  ;;  %s278_s29 = scalar_lea.vmem %s1503_s7, %s1053_s26 }
  0x15   : > { %285 = vrot.lane.b32.xlu0 %v1174_v0, %s1108_s9  ;;  %336 = vrot.lane.b32.xlu1 %v1182_v1, %s1106_s30 }
  0x19   : > { %287 = vrot.lane.b32.xlu1 %v1182_v1, %s1108_s9  ;;  %312 = vrot.lane.b32.xlu0 %v1182_v1, %s1107_s8 }
  0x1d   : > { %360 = vrot.lane.b32.xlu1 %v1182_v1, %s1109_s10  ;;  %358 = vrot.lane.b32.xlu0 %v1174_v0, %s1109_s10 }
  0x21   : > { %386 = vrot.lane.b32.xlu1 %v1182_v1, %s1110_s11  ;;  %384 = vrot.lane.b32.xlu0 %v1174_v0, %s1110_s11 }
  0x25   : > { %410 = vrot.lane.b32.xlu1 %v1182_v1, %s1111_s12  ;;  %408 = vrot.lane.b32.xlu0 %v1174_v0, %s1111_s12 }
  0x29   : > { %434 = vrot.lane.b32.xlu1 %v1182_v1, %s1112_s13  ;;  %432 = vrot.lane.b32.xlu0 %v1174_v0, %s1112_s13 }
  0x2d   : > { %458 = vrot.lane.b32.xlu1 %v1182_v1, %s1114_s14  ;;  %456 = vrot.lane.b32.xlu0 %v1174_v0, %s1114_s14 }
  0x31   : > { %542 = vperm.xlu0 %1090, %v1218_v3  }
  0x83   : > { %v335_v7 = vpop.permute.xlu1 %334  ;;  %v311_v8 = vpop.permute.xlu0 %310 }
  0x87   : > { %v286_v13 = vpop.permute.xlu0 %285  ;;  %v337_v16 = vpop.permute.xlu1 %336 }
  0x88   : > { %v339_v19 = vsel %vm338_vm0, %v335_v7, %v337_v16  ;;  %v340_v20 = vsel %vm338_vm0, %v337_v16, %v335_v7 }
  0x89   : > { %v354_v27 = vmul.f32 %v1235_v14, %v340_v20  ;;  %v355_v28 = vmul.f32 %v1238_v15, %v339_v19  ;;  %v1040_v20 = vld [vmem:[%s1497_s1 + $0x7] ss:$8 sm:$0x3] }
  0x8b   : > { %v288_v29 = vpop.permute.xlu1 %287  ;;  %v313_v30 = vpop.permute.xlu0 %312  ;;  %v356_v43 = vpack.c.bf16 %v354_v27, %v354_v27  ;;  %v357_v44 = vpack.c.bf16 %v355_v28, %v355_v28 }
  0x8c   : > { %v292_v32 = vsel %vm291_vm1, %v286_v13, %v288_v29  ;;  %v293_v33 = vsel %vm291_vm1, %v288_v29, %v286_v13  ;;  %v315_v34 = vsel %vm314_vm2, %v311_v8, %v313_v30  ;;  %v316_v35 = vsel %vm314_vm2, %v313_v30, %v311_v8 }
  0x8d   : > { %v306_v39 = vmul.f32 %v1252_v21, %v293_v33  ;;  %v307_v40 = vmul.f32 %v1255_v22, %v292_v32  ;;  %v330_v41 = vmul.f32 %v1259_v23, %v316_v35  ;;  %v331_v42 = vmul.f32 %v1262_v24, %v315_v34 }
  0x8e   : > { %v486_v59 = vrot.slane %v356_v43, 4  ;;  %v487_v60 = vrot.slane %v357_v44, 4 }
  0x8f   : > { %v361_v45 = vpop.permute.xlu1 %360  ;;  %v359_v46 = vpop.permute.xlu0 %358  ;;  %v332_v48 = vpack.c.bf16 %v330_v41, %v330_v41  ;;  %v333_v49 = vpack.c.bf16 %v331_v42, %v331_v42  ;;  %v308_v55 = vpack.c.bf16 %v306_v39, %v306_v39  ;;  %v309_v56 = vpack.c.bf16 %v307_v40, %v307_v40  ;;  %v1041_v41 = vld [vmem:[%s1497_s1 + $0x10] ss:$8 sm:$0x3] }
  0x90   : > { %v363_v50 = vsel %vm362_vm3, %v359_v46, %v361_v45  ;;  %v364_v51 = vsel %vm362_vm3, %v361_v45, %v359_v46  ;;  %v1334_v39 = vrot.slane %v1040_v20, %v1223_v9  ;;  %v1337_v40 = vrot.slane %v1040_v20, %v1225_v10  ;;  %v539_v20 = vld [vmem:[%s1498_s2] sm:$0xf] }
  0x91   : > { %v378_v52 = vmul.f32 %v1266_v25, %v364_v51  ;;  %v379_v53 = vmul.f32 %v1274_v31, %v363_v50  ;;  %v482_v57 = vrot.slane %v332_v48, 6  ;;  %v483_v58 = vrot.slane %v333_v49, 6 }
  0x92   : > { %v383_v42 = vpack.c.bf16 %v1182_v1, %v1182_v1  ;;  %v382_v48 = vpack.c.bf16 %v1174_v0, %v1174_v0 }
  0x93   : > { %v380_v61 = vpack.c.bf16 %v378_v52, %v378_v52  ;;  %v381_v62 = vpack.c.bf16 %v379_v53, %v379_v53  ;;  %v387_v63 = vpop.permute.xlu1 %386  ;;  %v385_v4 = vpop.permute.xlu0 %384  ;;  %v510_v8 = vsel %vm504_vm4, %v309_v56, %v483_v58  ;;  %v507_v11 = vsel %vm504_vm4, %v308_v55, %v482_v57 }
  0x94   : > { %v389_v5 = vsel %vm388_vm5, %v385_v4, %v387_v63  ;;  %v390_v7 = vsel %vm388_vm5, %v387_v63, %v385_v4  ;;  %v515_v18 = vsel %vm511_vm6, %v510_v8, %v487_v60  ;;  %v513_v19 = vsel %vm511_vm6, %v507_v11, %v486_v59 }
  0x95   : > { %v490_v12 = vrot.slane %v380_v61, 2  ;;  %v491_v13 = vrot.slane %v381_v62, 2  ;;  %v404_v16 = vmul.f32 %v1289_v37, %v389_v5  ;;  %v405_v17 = vmul.f32 %v1292_v38, %v390_v7 }
  0x96   : > { %v1354_v55 = vrot.slane %v1041_v41, %v1223_v9  ;;  %v1357_v56 = vrot.slane %v1041_v41, %v1225_v10 }
  0x97   : > { %v411_v26 = vpop.permute.xlu1 %410  ;;  %v409_v27 = vpop.permute.xlu0 %408  ;;  %v521_v28 = vsel %vm516_vm8, %v515_v18, %v491_v13  ;;  %v518_v29 = vsel %vm516_vm8, %v513_v19, %v490_v12  ;;  %v406_v30 = vpack.c.bf16 %v404_v16, %v404_v16  ;;  %v407_v32 = vpack.c.bf16 %v405_v17, %v405_v17 }
  0x98   : > { %v413_v33 = vsel %vm412_vm7, %v409_v27, %v411_v26  ;;  %v414_v34 = vsel %vm412_vm7, %v411_v26, %v409_v27  ;;  %555 = vmatprep.subr.bf16.mxu0 %v521_v28 }
  0x99   : > { %v428_v35 = vmul.f32 %v1300_v47, %v413_v33  ;;  %v429_v36 = vmul.f32 %v1309_v54, %v414_v34  ;;  %556 = vmatpush1.bf16.msra.mxu0 %v518_v29  ;;  %v494_v49 = vrot.slane %v406_v30, 6  ;;  %v495_v50 = vrot.slane %v407_v32, 6 }
  0x9b   : > { %v430_v43 = vpack.c.bf16 %v428_v35, %v428_v35  ;;  %v431_v44 = vpack.c.bf16 %v429_v36, %v429_v36  ;;  %v435_v45 = vpop.permute.xlu1 %434  ;;  %v433_v46 = vpop.permute.xlu0 %432  ;;  %v528_v4 = vsel %vm504_vm4, %v383_v42, %v495_v50  ;;  %v525_v9 = vsel %vm504_vm4, %v382_v48, %v494_v49 }
  0x9c   : > { %v437_v51 = vsel %vm436_vm9, %v433_v46, %v435_v45  ;;  %v438_v52 = vsel %vm436_vm9, %v435_v45, %v433_v46  ;;  %v1115_v36 = vmov 1  }
  0x9d   : > { %v452_v53 = vmul.f32 %v1334_v39, %v437_v51  ;;  %v453_v1 = vmul.f32 %v1337_v40, %v438_v52  ;;  %v498_v57 = vrot.slane %v430_v43, 4  ;;  %v499_v0 = vrot.slane %v431_v44, 4  ;;  %1091 = vset.pattern.permute.xlu0 %v1115_v36 }
  0x9f   : > { %v454_v58 = vpack.c.bf16 %v452_v53, %v452_v53  ;;  %v455_v59 = vpack.c.bf16 %v453_v1, %v453_v1  ;;  %v459_v60 = vpop.permute.xlu1 %458  ;;  %v457_v61 = vpop.permute.xlu0 %456  ;;  %v532_v11 = vsel %vm511_vm6, %v528_v4, %v499_v0  ;;  %v530_v12 = vsel %vm511_vm6, %v525_v9, %v498_v57 }
  0xa0   : > { %v461_v62 = vsel %vm460_vm10, %v457_v61, %v459_v60  ;;  %v462_v63 = vsel %vm460_vm10, %v459_v60, %v457_v61 }
  0xa1   : > { %v502_v5 = vrot.slane %v454_v58, 2  ;;  %v503_v7 = vrot.slane %v455_v59, 2  ;;  %v476_v10 = vmul.f32 %v1354_v55, %v461_v62  ;;  %v477_v8 = vmul.f32 %v1357_v56, %v462_v63 }
  0xa3   : > { %v478_v13 = vpack.c.bf16 %v476_v10, %v476_v10  ;;  %v479_v16 = vpack.c.bf16 %v477_v8, %v477_v8  ;;  %v537_v17 = vsel %vm516_vm8, %v532_v11, %v503_v7  ;;  %v534_v18 = vsel %vm516_vm8, %v530_v12, %v502_v5 }
  0xa4   : > { %557 = vmatprep.subr.bf16.mxu0 %v537_v17 }
  0xa5   : > { %558 = vmatpush1.bf16.msra.mxu0 %v534_v18  ;;  %v550_v19 = vsel %vm504_vm4, %v478_v13, 0 }
  0xa6   : > { %1042 = vmatprep.subr.msk.bf16.mxu0 %vm504_vm4, %v479_v16 }
  0xa9   : > { %560 = vmatpush1.bf16.msra.mxu0 %v550_v19 }
  0xac   : > { %1043 = vmatmul.mubr.msk.bf16.vlgmr.msra.gmra.mrb[0].mxu0 %vm545_vm11, %v539_v20 }
  0xb0   : > { %v543_v26 = vpop.permute.xlu0 %542 }
 0x17f   : > { %v589_v27 = vpop.f32.mrb[0].mxu0 }
 0x180   : > { %v590_v28 = vadd.f32 %v589_v27, %v543_v26  ;;  %v591_v29 = vpop.f32.mrb[1].mxu0 }
 0x181   : > { %v593_v30 = vpop.f32.mrb[2].mxu0  ;;  %v592_v33 = vadd.f32 %v591_v29, %v543_v26 }
 0x182   : > { %v1376_v32 = vmax.f32 %v590_v28, 0.0  ;;  %v594_v34 = vpop.f32.mrb[3].mxu0 }
 0x183   : > { %v1382_v35 = vmax.f32 %v592_v33, 0.0 }
 0x184   : > { %599 = vrot.lane.b32.xlu0 %v1376_v32, %s1108_s9  ;;  %609 = vrot.lane.b32.xlu1 %v1376_v32, %s1107_s8 }
 0x188   : > { %629 = vrot.lane.b32.xlu0 %v1376_v32, %s1109_s10  ;;  %611 = vrot.lane.b32.xlu1 %v1382_v35, %s1107_s8 }
 0x18c   : > { %619 = vrot.lane.b32.xlu0 %v1376_v32, %s1106_s30  ;;  %601 = vrot.lane.b32.xlu1 %v1382_v35, %s1108_s9 }
 0x190   : > { %641 = vrot.lane.b32.xlu0 %v1376_v32, %s1110_s11  ;;  %631 = vrot.lane.b32.xlu1 %v1382_v35, %s1109_s10 }
 0x194   : > { %661 = vrot.lane.b32.xlu0 %v1376_v32, %s1112_s13  ;;  %621 = vrot.lane.b32.xlu1 %v1382_v35, %s1106_s30 }
 0x198   : > { %651 = vrot.lane.b32.xlu0 %v1376_v32, %s1111_s12  ;;  %643 = vrot.lane.b32.xlu1 %v1382_v35, %s1110_s11  ;;  %s1118_s11 = smov 126  }
 0x19c   : > { %671 = vrot.lane.b32.xlu0 %v1376_v32, %s1114_s14  ;;  %663 = vrot.lane.b32.xlu1 %v1382_v35, %s1112_s13 }
 0x1a0   : > { %653 = vrot.lane.b32.xlu1 %v1382_v35, %s1111_s12  ;;  %732 = vperm.xlu0 %1091, %v1218_v3  }
 0x1a4   : > { %673 = vrot.lane.b32.xlu1 %v1382_v35, %s1114_s14  ;;  %1092 = vset.pattern.permute.xlu0 %v1113_v2  ;;  %s1119_s14 = smov 125  }
 0x1f6   : > { %v600_v41 = vpop.permute.xlu0 %599  ;;  %v610_v42 = vpop.permute.xlu1 %609 }
 0x1fa   : > { %v630_v43 = vpop.permute.xlu0 %629  ;;  %v612_v44 = vpop.permute.xlu1 %611 }
 0x1fb   : > { %v613_v45 = vsel %vm314_vm2, %v610_v42, %v612_v44  ;;  %v614_v46 = vsel %vm314_vm2, %v612_v44, %v610_v42 }
 0x1fc   : > { %v615_v48 = vmul.f32 %v614_v46, %v1259_v23  ;;  %v616_v49 = vmul.f32 %v613_v45, %v1262_v24 }
 0x1fe   : > { %v617_v50 = vpack.c.bf16 %v615_v48, %v615_v48  ;;  %v618_v51 = vpack.c.bf16 %v616_v49, %v616_v49  ;;  %v620_v52 = vpop.permute.xlu0 %619  ;;  %v602_v53 = vpop.permute.xlu1 %601 }
 0x1ff   : > { %v603_v2 = vsel %vm291_vm1, %v600_v41, %v602_v53  ;;  %v604_v1 = vsel %vm291_vm1, %v602_v53, %v600_v41 }
 0x200   : > { %v605_v57 = vmul.f32 %v604_v1, %v1252_v21  ;;  %v606_v0 = vmul.f32 %v603_v2, %v1255_v22  ;;  %v683_v58 = vrot.slane %v617_v50, 4  ;;  %v684_v59 = vrot.slane %v618_v51, 4 }
 0x202   : > { %v607_v60 = vpack.c.bf16 %v605_v57, %v605_v57  ;;  %v608_v23 = vpack.c.bf16 %v606_v0, %v606_v0  ;;  %v632_v61 = vpop.permute.xlu1 %631  ;;  %v642_v63 = vpop.permute.xlu0 %641 }
 0x203   : > { %v633_v24 = vsel %vm362_vm3, %v630_v43, %v632_v61  ;;  %v634_v62 = vsel %vm362_vm3, %v632_v61, %v630_v43 }
 0x204   : > { %v635_v4 = vmul.f32 %v634_v62, %v1266_v25  ;;  %v636_v9 = vmul.f32 %v633_v24, %v1274_v31  ;;  %v703_v21 = vsel %vm511_vm6, %v608_v23, %v684_v59  ;;  %v699_v22 = vsel %vm511_vm6, %v607_v60, %v683_v58 }
 0x205   : > { %745 = vmatprep.subr.bf16.mxu1 %v703_v21 }
 0x206   : > { %v637_v5 = vpack.c.bf16 %v635_v4, %v635_v4  ;;  %v638_v7 = vpack.c.bf16 %v636_v9, %v636_v9  ;;  %746 = vmatpush1.bf16.msra.mxu1 %v699_v22  ;;  %v622_v10 = vpop.permute.xlu1 %621  ;;  %v662_v16 = vpop.permute.xlu0 %661 }
 0x207   : > { %v623_v8 = vsel %vm338_vm0, %v620_v52, %v622_v10  ;;  %v624_v11 = vsel %vm338_vm0, %v622_v10, %v620_v52  ;;  %vm878_vm0 = vcmask 7168  }
 0x208   : > { %v625_v12 = vmul.f32 %v624_v11, %v1235_v14  ;;  %v626_v25 = vmul.f32 %v623_v8, %v1238_v15  ;;  %v687_v31 = vrot.slane %v637_v5, 4  ;;  %v688_v13 = vrot.slane %v638_v7, 4  ;;  %v794_v11 = vld [vmem:[%s1500_s4] sm:$0x1] }
 0x209   : > { %v1116_v8 = vmov 0.0   ;;  %796 = vrot.lane.b32.xlu0 %v794_v11, %s1118_s11 }
 0x20a   : > { %v627_v17 = vpack.c.bf16 %v625_v12, %v625_v12  ;;  %v628_v18 = vpack.c.bf16 %v626_v25, %v626_v25  ;;  %v644_v19 = vpop.permute.xlu1 %643  ;;  %v652_v41 = vpop.permute.xlu0 %651  ;;  %1058 = vmatprep.subr.mxu0 %v1116_v8  ;;  %1060 = vmatprep.mubr.msk.f32.mxu0 %vm1117_vm13, %v1116_v8 }
 0x20b   : > { %v645_v20 = vsel %vm388_vm5, %v642_v63, %v644_v19  ;;  %v646_v26 = vsel %vm388_vm5, %v644_v19, %v642_v63 }
 0x20c   : > { %v647_v27 = vmul.f32 %v645_v20, %v1289_v37  ;;  %v648_v28 = vmul.f32 %v646_v26, %v1292_v38  ;;  %v711_v14 = vsel %vm511_vm6, %v628_v18, %v688_v13  ;;  %v707_v15 = vsel %vm511_vm6, %v627_v17, %v687_v31  ;;  %v793_v31 = vld [vmem:[%s1501_s5] sm:$0x1] }
 0x20d   : > { %747 = vmatprep.subr.bf16.mxu1 %v711_v14  ;;  %v640_v37 = vpack.c.bf16 %v1382_v35, %v1382_v35  ;;  %v639_v38 = vpack.c.bf16 %v1376_v32, %v1376_v32  ;;  %875 = vrot.lane.b32.xlu0 %v1218_v3, %s1119_s14  ;;  %v874_v20 = vld [vmem:[%s1502_s6] sm:$0xff] }
 0x20e   : > { %v649_v29 = vpack.c.bf16 %v647_v27, %v647_v27  ;;  %v650_v30 = vpack.c.bf16 %v648_v28, %v648_v28  ;;  %748 = vmatpush1.bf16.msra.mxu1 %v707_v15  ;;  %v664_v33 = vpop.permute.xlu1 %663 }
 0x20f   : > { %v665_v34 = vsel %vm436_vm9, %v662_v16, %v664_v33  ;;  %v666_v36 = vsel %vm436_vm9, %v664_v33, %v662_v16 }
 0x210   : > { %v691_v42 = vrot.slane %v649_v29, 4  ;;  %v692_v43 = vrot.slane %v650_v30, 4  ;;  %v667_v44 = vmul.f32 %v665_v34, %v1334_v39  ;;  %v668_v45 = vmul.f32 %v666_v36, %v1337_v40  ;;  %v672_v40 = vpop.permute.xlu0 %671 }
 0x212   : > { %v669_v46 = vpack.c.bf16 %v667_v44, %v667_v44  ;;  %v670_v48 = vpack.c.bf16 %v668_v45, %v668_v45  ;;  %v654_v49 = vpop.permute.xlu1 %653  ;;  %v719_v50 = vsel %vm511_vm6, %v640_v37, %v692_v43  ;;  %v715_v51 = vsel %vm511_vm6, %v639_v38, %v691_v42 }
 0x213   : > { %v655_v35 = vsel %vm412_vm7, %v652_v41, %v654_v49  ;;  %v656_v32 = vsel %vm412_vm7, %v654_v49, %v652_v41  ;;  %749 = vmatprep.subr.bf16.mxu1 %v719_v50 }
 0x214   : > { %v657_v52 = vmul.f32 %v655_v35, %v1300_v47  ;;  %v658_v39 = vmul.f32 %v656_v32, %v1309_v54  ;;  %750 = vmatpush1.bf16.msra.mxu1 %v715_v51  ;;  %v695_v53 = vrot.slane %v669_v46, 4  ;;  %v696_v2 = vrot.slane %v670_v48, 4 }
 0x216   : > { %v659_v1 = vpack.c.bf16 %v657_v52, %v657_v52  ;;  %v660_v57 = vpack.c.bf16 %v658_v39, %v658_v39  ;;  %v674_v0 = vpop.permute.xlu1 %673 }
 0x217   : > { %v675_v58 = vsel %vm460_vm10, %v672_v40, %v674_v0  ;;  %v676_v59 = vsel %vm460_vm10, %v674_v0, %v672_v40 }
 0x218   : > { %v677_v60 = vmul.f32 %v675_v58, %v1354_v55  ;;  %v678_v23 = vmul.f32 %v676_v59, %v1357_v56  ;;  %v727_v47 = vsel %vm511_vm6, %v660_v57, %v696_v2  ;;  %v723_v54 = vsel %vm511_vm6, %v659_v1, %v695_v53 }
 0x219   : > { %751 = vmatprep.subr.bf16.mxu1 %v727_v47 }
 0x21a   : > { %v679_v61 = vpack.c.bf16 %v677_v60, %v677_v60  ;;  %v680_v24 = vpack.c.bf16 %v678_v23, %v678_v23  ;;  %752 = vmatpush1.bf16.msra.mxu1 %v723_v54 }
 0x21c   : > { %1044 = vmatprep.subr.msk.bf16.mxu1 %vm511_vm6, %v680_v24  ;;  %v740_v62 = vsel %vm511_vm6, %v679_v61, 0 }
 0x21e   : > { %754 = vmatpush1.bf16.msra.mxu1 %v740_v62 }
 0x21f   : > { %v733_v55 = vpop.permute.xlu0 %732 }
 0x221   : > { %1045 = vmatmul.mubr.msk.bf16.vlgmr.msra.gmra.mrb[0].mxu1 %vm735_vm12, %v729_v6 }
 0x27b   : > { %v797_v13 = vpop.permute.xlu0 %796 }
 0x27f   : > { %v876_v26 = vpop.permute.xlu0 %875 }
 0x2f4   : > { %v779_v56 = vpop.f32.mrb[0].mxu1 }
 0x2f5   : > { %v780_v63 = vadd.f32 %v779_v56, %v733_v55  ;;  %v781_v4 = vpop.f32.mrb[1].mxu1 }
 0x2f6   : > { %v782_v9 = vadd.f32 %v781_v4, %v733_v55  ;;  %v783_v21 = vpop.f32.mrb[2].mxu1 }
 0x2f7   : > { %v786_v22 = vmax.f32 %v780_v63, 0.0  ;;  %v784_v5 = vpop.f32.mrb[3].mxu1 }
 0x2f8   : > { %v787_v7 = vmax.f32 %v782_v9, 0.0 }
 0x2fa   : > { %v788_v10 = vadd.f32 %v787_v7, %v786_v22 }
 0x2fc   : > { %789 = vadd.xlane.f32.xlu1 %v788_v10 }
 0x389   : > { %v790_v12 = vpop.xlane.xlu1 %789 }
 0x38a   : > { %v792_v25 = vmul.f32 0.00390625, %v790_v12 }
 0x38c   : > { %1059 = vmatpush3.msra.mxu0 %v792_v25 }
 0x38d   : > { %1061 = vmatmul.mubr.msk.f32.vlgmr.msra.gmra.mrb[4].mxu0 %vm799_vm14, %v793_v31  ;;  %1063 = vmatprep.subr.mxu0 %v1116_v8 }
 0x38e   : > { %1065 = vmatprep.mubr.msk.f32.mxu0 %vm1117_vm13, %v1116_v8 }
 0x460   : > { %v869_v16 = vpop.f32.mrb[4].mxu0 }
 0x461   : > { %v870_v17 = vadd.f32 %v869_v16, %v797_v13  ;;  %v1062_v18 = vpop.f32.mrb[5].mxu0 }
 0x463   : > { %v873_v19 = vmax.f32 %v870_v17, 0.0 }
 0x465   : > { %1064 = vmatpush3.msk.msra.mxu0 %vm882_vm15, %v873_v19 }
 0x466   : > { %1066 = vmatmul.mubr.msk.f32.vlgmr.msra.gmra.mrb[6].mxu0 %vm878_vm0, %v874_v20 }
 0x539   : > { %v952_v27 = vpop.f32.mrb[6].mxu0 }
 0x53a   : > { %v953_v28 = vadd.f32 %v952_v27, %v876_v26  ;;  %v1067_v14 = vpop.f32.mrb[7].mxu0 }
 0x53c   : > { %v1049_v15 = vmul.f32 -1.442695, %v953_v28 }
 0x53e   : > { %1094 = vpow2.f32 %v1049_v15 }
 0x548   : > { %v1095_v3 = vpop.eup %1094 }
 0x549   : > { %v959_v29 = vadd.f32 1.0, %v1095_v3 }
 0x54b   : > { %1096 = vrcp.f32 %v959_v29 }
 0x555   : > { %v1097_v30 = vpop.eup %1096 }
 0x556   : > { %964 = vperm.xlu0 %1092, %v1097_v30  }
 0x5d5   : > { %v965_v33 = vpop.permute.xlu0 %964 }
 0x5d6   : > { %v967_v34 = vmul.f32 %v965_v33, %v786_v22  ;;  %v968_v36 = vmul.f32 %v965_v33, %v787_v7 }
 0x5d8   : > { %969 = vst [vmem:[%s278_s29] sm:$0xff] %v967_v34  ;;  %970 = vst [vmem:[%s278_s29 + $0x8] sm:$0xff] %v968_v36 }
 0x5d9 PF: > { %s17_s24 = sadd.s32 1, %s1104_s24  }
 0x5da   : > { %p14_p4 = scmp.ge.s32.totalorder %s17_s24, 4  }
 0x5dc   :  { %16 = sbr.rel (!%p14_p4) target bundleno = 1 (0x1), region = 85 }

</bundles_post_ra>
